<compile_context>
chip_gen: v6e
topology: v6e:2x2x1
jax: 0.10.0
libtpu: 0.0.40
codegen_flags: <defaults>
</compile_context>

<pallas_src>
import jax
import jax.numpy as jnp
from jax.experimental import pallas as pl
from jax.experimental.pallas import tpu as pltpu


# ----------------------------------------------------------------------------- #
# Kernel
# ----------------------------------------------------------------------------- #
def _moment_pooling_kernel(feat_ref, tm_ref, fm_ref, bm_ref, cnt_ref,
                           w1_ref, b1_ref, w2_ref, b2_ref, out_ref, acc_ref):
    t = pl.program_id(1)

    # ---- init accumulator on the first T step ---------------------------------
    @pl.when(t == 0)
    def _init():
        acc_ref[...] = jnp.zeros_like(acc_ref)

    # ---- accumulate: one batched MXU pass gives all three masked sums ---------
    feat = feat_ref[...]                                   # (Bt, Tt, D) native dtype
    masks = jnp.concatenate(
        [tm_ref[...], fm_ref[...], bm_ref[...]], axis=1)   # (Bt, 3, Tt) sublane pack
    if masks.dtype != feat.dtype:                          # trace-time guard only;
        masks = masks.astype(feat.dtype)                   # wrapper pre-matches dtypes
    acc_ref[...] += jnp.einsum("bst,btd->bsd", masks, feat,
                               preferred_element_type=jnp.float32)   # f32 accum

    # ---- finalize on the last T step: averages -> MLP head --------------------
    @pl.when(t == pl.num_programs(1) - 1)
    def _finalize():
        bt = acc_ref.shape[0]
        d = w1_ref.shape[1]

        acc = acc_ref[...]                                 # (Bt, 3, D) f32
        cnt = cnt_ref[...][:, 0, :] + 1e-6                 # (Bt, 3)   f32 (hoisted sums)
        tgt = acc[:, 0, :] / cnt[:, 0:1]                   # target moment feat (Bt, D)
        fore_c = acc[:, 1, :] / cnt[:, 1:2]                # fore context feat  (Bt, D)
        back_c = acc[:, 2, :] / cnt[:, 2:3]                # back context feat  (Bt, D)

        w1 = w1_ref[...]                                   # (2D, D) pre-transposed
        b1 = b1_ref[...].astype(jnp.float32)               # (1, D)

        # Two batched matmuls replace four thin ones (shared Linear(2D->D) weights):
        #   rows [0, Bt):   fore_c @ w1[:D] + tgt    @ w1[D:]  -> fore pre-activation
        #   rows [Bt, 2Bt): tgt    @ w1[:D] + back_c @ w1[D:]  -> back pre-activation
        s1 = jnp.concatenate([fore_c, tgt], axis=0)        # (2Bt, D)
        s2 = jnp.concatenate([tgt, back_c], axis=0)        # (2Bt, D)
        hid = jnp.maximum(
            jnp.dot(s1, w1[:d, :], preferred_element_type=jnp.float32)
            + jnp.dot(s2, w1[d:, :], preferred_element_type=jnp.float32)
            + b1, 0.0)                                     # ReLU, (2Bt, D)
        fore_feat = hid[:bt, :]
        back_feat = hid[bt:, :]

        # TODO(synk): training-mode Dropout(p=0.5) would use pltpu.prng_seed +
        # pltpu.prng_random_bits; the eval-mode forward pass is identity.

        w2 = w2_ref[...]                                   # (3D, 2) pre-transposed
        b2 = b2_ref[...].astype(jnp.float32)               # (1, 2)
        out = (jnp.dot(tgt, w2[:d, :], preferred_element_type=jnp.float32)
               + jnp.dot(fore_feat, w2[d:2 * d, :], preferred_element_type=jnp.float32)
               + jnp.dot(back_feat, w2[2 * d:, :], preferred_element_type=jnp.float32)
               + b2)                                       # (Bt, 2)
        out_ref[...] = out[:, None, :].astype(out_ref.dtype)


# ----------------------------------------------------------------------------- #
# Wrapper
# ----------------------------------------------------------------------------- #
def _round_up(x, m):
    return -(-x // m) * m


def _padded_block_bytes(shape, dtype):
    """Physical VMEM bytes of a block after (sublane, lane) tile padding."""
    itemsize = jnp.dtype(dtype).itemsize
    sub = max(8, 32 // itemsize)            # 8 rows f32, 16 bf16, 32 int8
    dims = list(shape)
    if len(dims) == 1:
        dims = [1] + dims
    dims[-1] = _round_up(dims[-1], 128)     # lane padding (D=32 -> 128!)
    dims[-2] = _round_up(dims[-2], sub)     # sublane padding
    n = 1
    for x in dims:
        n *= x
    return n * itemsize


def _pick_block_b(B):
    """Largest divisor of B (<= 8) that still yields >= 2 batch blocks (v7x TCs)."""
    if B <= 1:
        return 1
    best = 1
    for d in range(1, min(B // 2, 8) + 1):
        if B % d == 0:
            best = d
    return best


def moment_pooling(feat, target_mask, fore_mask, back_mask, w1, b1, w2, b2,
                   *, block_b=None, block_t=None, vmem_limit_bytes=None):
    """feat: (B,T,D); masks: (B,T); w1: (2D,D); b1: (1,D); w2: (3D,2); b2: (1,2)."""
    B, T, D = feat.shape
    cdt = feat.dtype                        # compute dtype (bf16-ready)

    # ---- per-chip VMEM budget (leave headroom; v7x has only 64 MiB / TC) ------
    if vmem_limit_bytes is None:
        try:
            cap = int(pltpu.get_tpu_info().vmem_capacity_bytes)
        except Exception:
            cap = 64 * 1024 * 1024          # v7x-safe fallback
        vmem_limit_bytes = min((cap * 3) // 4, 100 * 1024 * 1024)
    vmem_limit_bytes = int(vmem_limit_bytes)

    # ---- batch tile (grid axis 0, "parallel" -> megacore / v7x dual TC) -------
    if block_b is None:
        block_b = _pick_block_b(B)
    block_b = max(1, min(block_b, B))
    Bp = _round_up(B, block_b)

    # ---- time tile (grid axis 1, "arbitrary" reduction), padded-bytes budget --
    def pipeline_bytes(bt_):                # double-buffered streaming inputs/outputs
        f = _padded_block_bytes((block_b, bt_, D), cdt)
        m = _padded_block_bytes((block_b, 1, bt_), cdt)
        c = _padded_block_bytes((block_b, 1, 3), jnp.float32)
        o = _padded_block_bytes((block_b, 1, 2), jnp.float32)
        return 2 * (f + 3 * m + c + o)

    fixed_bytes = (_padded_block_bytes((block_b, 3, D), jnp.float32)   # accumulator
                   + 2 * (_padded_block_bytes(w1.shape, w1.dtype)
                          + _padded_block_bytes(b1.shape, b1.dtype)
                          + _padded_block_bytes(w2.shape, w2.dtype)
                          + _padded_block_bytes(b2.shape, b2.dtype)))
    budget = max(0, (vmem_limit_bytes * 3) // 4 - fixed_bytes)

    if block_t is None:
        if T <= 128 or pipeline_bytes(T) <= budget:
            block_t = T                     # whole sequence in one block (common case)
        else:
            n = 1                           # largest 128-multiple that fits the budget
            while (n + 1) * 128 < T and pipeline_bytes((n + 1) * 128) <= budget:
                n += 1
            block_t = n * 128
            for m in range(block_t // 128, 0, -1):   # prefer exact divisor -> no pad
                if T % (m * 128) == 0:
                    block_t = m * 128
                    break
    if block_t >= T:
        block_t, Tp = T, T                  # full-extent block: always legal
    else:
        block_t = max(128, (block_t // 128) * 128)   # lane-aligned (mask last dim)
        Tp = _round_up(T, block_t)

    # ---- inputs: zero-copy mask views + hoisted mask counts -------------------
    tm = target_mask.astype(cdt).reshape(B, 1, T)
    fm = fore_mask.astype(cdt).reshape(B, 1, T)
    bm = back_mask.astype(cdt).reshape(B, 1, T)
    counts = jnp.stack(
        [jnp.sum(target_mask.astype(jnp.float32), axis=1),
         jnp.sum(fore_mask.astype(jnp.float32), axis=1),
         jnp.sum(back_mask.astype(jnp.float32), axis=1)],
        axis=1).reshape(B, 1, 3)

    # Padding fallback (only when tiles don't divide B/T exactly). Zero padding
    # keeps the masked averages exact (padded mask entries are 0).
    if (Bp, Tp) != (B, T):
        feat = jnp.pad(feat, ((0, Bp - B), (0, Tp - T), (0, 0)))
        tm = jnp.pad(tm, ((0, Bp - B), (0, 0), (0, Tp - T)))
        fm = jnp.pad(fm, ((0, Bp - B), (0, 0), (0, Tp - T)))
        bm = jnp.pad(bm, ((0, Bp - B), (0, 0), (0, Tp - T)))
        counts = jnp.pad(counts, ((0, Bp - B), (0, 0), (0, 0)))

    grid = (Bp // block_b, Tp // block_t)

    grid_spec = pltpu.PrefetchScalarGridSpec(
        num_scalar_prefetch=0,
        grid=grid,
        in_specs=[
            pl.BlockSpec((block_b, block_t, D), lambda b, t: (b, t, 0)),   # feat tiles
            pl.BlockSpec((block_b, 1, block_t), lambda b, t: (b, 0, t)),   # target mask
            pl.BlockSpec((block_b, 1, block_t), lambda b, t: (b, 0, t)),   # fore mask
            pl.BlockSpec((block_b, 1, block_t), lambda b, t: (b, 0, t)),   # back mask
            pl.BlockSpec((block_b, 1, 3), lambda b, t: (b, 0, 0)),         # mask counts
            pl.BlockSpec(w1.shape, lambda b, t: (0, 0)),                   # weights stay
            pl.BlockSpec(b1.shape, lambda b, t: (0, 0)),                   #   resident
            pl.BlockSpec(w2.shape, lambda b, t: (0, 0)),
            pl.BlockSpec(b2.shape, lambda b, t: (0, 0)),
        ],
        out_specs=pl.BlockSpec((block_b, 1, 2), lambda b, t: (b, 0, 0)),
        scratch_shapes=[
            pltpu.VMEM((block_b, 3, D), jnp.float32),   # masked-sum accumulator
        ],
    )

    out = pl.pallas_call(
        _moment_pooling_kernel,
        out_shape=jax.ShapeDtypeStruct((Bp, 1, 2), jnp.float32),
        grid_spec=grid_spec,
        compiler_params=pltpu.CompilerParams(
            dimension_semantics=("parallel", "arbitrary"),
            vmem_limit_bytes=vmem_limit_bytes),
    )(feat, tm, fm, bm, counts, w1, b1, w2, b2)

    return out[:B, 0, :]


# ----------------------------------------------------------------------------- #
# Pure-JAX reference + tests
# ----------------------------------------------------------------------------- #
def _reference(feat, tmask, fmask, bmask, w1, b1, w2, b2):
    """Pure-JAX reference mirroring the PyTorch forward (eval mode), f32 math."""
    feat = feat.astype(jnp.float32)
    tmask, fmask, bmask = (m.astype(jnp.float32) for m in (tmask, fmask, bmask))

    def avg(mask):
        return jnp.sum(feat * mask[:, :, None], axis=1) / (
            jnp.sum(mask, axis=1, keepdims=True) + 1e-6)

    tgt, fore_c, back_c = avg(tmask), avg(fmask), avg(bmask)
    fore = jax.nn.relu(jnp.concatenate([fore_c, tgt], -1) @ w1 + b1[0])
    back = jax.nn.relu(jnp.concatenate([tgt, back_c], -1) @ w1 + b1[0])
    cat = jnp.concatenate([tgt, fore, back], -1)
    return cat @ w2 + b2[0]


if __name__ == "__main__":
    D = 32  # visual_dim
    key = jax.random.PRNGKey(0)
    keys = jax.random.split(key, 8)

    # Deterministic synthetic parameters (nn.Linear(2D, D) / nn.Linear(3D, 2)),
    # stored pre-transposed as (in_dim, out_dim).
    w1 = jax.random.normal(keys[4], (2 * D, D), dtype=jnp.float32) * 0.05
    b1 = jax.random.normal(keys[5], (1, D), dtype=jnp.float32) * 0.05
    w2 = jax.random.normal(keys[6], (3 * D, 2), dtype=jnp.float32) * 0.05
    b2 = jax.random.normal(keys[7], (1, 2), dtype=jnp.float32) * 0.05

    # --- test 1: tiny f32 shapes, auto tiling (grid[0]=2 -> v7x dual-TC) -------
    B, T = 2, 8
    feat = jax.random.normal(keys[0], (B, T, D), dtype=jnp.float32)
    tmask = (jax.random.uniform(keys[1], (B, T)) > 0.5).astype(jnp.float32)
    fmask = (jax.random.uniform(keys[2], (B, T)) > 0.5).astype(jnp.float32)
    bmask = (jax.random.uniform(keys[3], (B, T)) > 0.5).astype(jnp.float32)

    out = moment_pooling(feat, tmask, fmask, bmask, w1, b1, w2, b2)
    jax.block_until_ready(out)
    ref = _reference(feat, tmask, fmask, bmask, w1, b1, w2, b2)
    assert out.shape == (B, 2), out.shape
    assert jnp.allclose(out, ref, atol=2e-4, rtol=2e-4), (out, ref)

    # --- test 2: bf16 feat/masks (halved HBM traffic), explicit B/T tiling -----
    B2, T2 = 10, 384
    k2 = jax.random.split(jax.random.PRNGKey(1), 4)
    feat2 = jax.random.normal(k2[0], (B2, T2, D), dtype=jnp.bfloat16)
    tmask2 = (jax.random.uniform(k2[1], (B2, T2)) > 0.5).astype(jnp.bfloat16)
    fmask2 = (jax.random.uniform(k2[2], (B2, T2)) > 0.5).astype(jnp.bfloat16)
    bmask2 = (jax.random.uniform(k2[3], (B2, T2)) > 0.5).astype(jnp.bfloat16)

    out2 = moment_pooling(feat2, tmask2, fmask2, bmask2, w1, b1, w2, b2,
                          block_b=5, block_t=128)   # exact divisors: no padding
    jax.block_until_ready(out2)
    ref2 = _reference(feat2, tmask2, fmask2, bmask2, w1, b1, w2, b2)
    assert out2.shape == (B2, 2), out2.shape
    assert jnp.allclose(out2, ref2, atol=1e-2, rtol=1e-2), (out2, ref2)

    # --- test 3: odd B/T forcing the zero-padding fallback path ----------------
    B3, T3 = 3, 200
    k3 = jax.random.split(jax.random.PRNGKey(2), 4)
    feat3 = jax.random.normal(k3[0], (B3, T3, D), dtype=jnp.float32)
    tmask3 = (jax.random.uniform(k3[1], (B3, T3)) > 0.5).astype(jnp.float32)
    fmask3 = (jax.random.uniform(k3[2], (B3, T3)) > 0.5).astype(jnp.float32)
    bmask3 = (jax.random.uniform(k3[3], (B3, T3)) > 0.5).astype(jnp.float32)

    out3 = moment_pooling(feat3, tmask3, fmask3, bmask3, w1, b1, w2, b2,
                          block_b=2, block_t=128)
    jax.block_until_ready(out3)
    ref3 = _reference(feat3, tmask3, fmask3, bmask3, w1, b1, w2, b2)
    assert out3.shape == (B3, 2), out3.shape
    assert jnp.allclose(out3, ref3, atol=2e-4, rtol=2e-4), (out3, ref3)

    print("KERNEL_OK")
</pallas_src>

<mosaic_0001>
module attributes {stable_mosaic.version = 11 : i64} {
  func.func @_moment_pooling_kernel(%arg0: i32, %arg1: i32, %arg2: memref<1x8x32xf32, #tpu.memory_space<vmem>>, %arg3: memref<1x1x8xf32, #tpu.memory_space<vmem>>, %arg4: memref<1x1x8xf32, #tpu.memory_space<vmem>>, %arg5: memref<1x1x8xf32, #tpu.memory_space<vmem>>, %arg6: memref<1x1x3xf32, #tpu.memory_space<vmem>>, %arg7: memref<64x32xf32, #tpu.memory_space<vmem>>, %arg8: memref<1x32xf32, #tpu.memory_space<vmem>>, %arg9: memref<96x2xf32, #tpu.memory_space<vmem>>, %arg10: memref<1x2xf32, #tpu.memory_space<vmem>>, %arg11: memref<1x1x2xf32, #tpu.memory_space<vmem>>, %arg12: memref<1x3x32xf32, #tpu.memory_space<vmem>>) attributes {dimension_semantics = [#tpu.dimension_semantics<parallel>, #tpu.dimension_semantics<arbitrary>], iteration_bounds = array<i64: 2, 1>, scalar_prefetch = 0 : i64, scratch_operands = 1 : i64, tpu.core_type = #tpu.core_type<tc>, window_params = [{transform_indices = @transform_0, window_bounds = array<i64: 1, 8, 32>}, {transform_indices = @transform_1, window_bounds = array<i64: 1, 1, 8>}, {transform_indices = @transform_2, window_bounds = array<i64: 1, 1, 8>}, {transform_indices = @transform_3, window_bounds = array<i64: 1, 1, 8>}, {transform_indices = @transform_4, window_bounds = array<i64: 1, 1, 3>}, {pipeline_mode = #tpu.pipeline_mode<synchronous>, transform_indices = @transform_5, window_bounds = array<i64: 64, 32>}, {pipeline_mode = #tpu.pipeline_mode<synchronous>, transform_indices = @transform_6, window_bounds = array<i64: 1, 32>}, {pipeline_mode = #tpu.pipeline_mode<synchronous>, transform_indices = @transform_7, window_bounds = array<i64: 96, 2>}, {pipeline_mode = #tpu.pipeline_mode<synchronous>, transform_indices = @transform_8, window_bounds = array<i64: 1, 2>}, {transform_indices = @transform_9, window_bounds = array<i64: 1, 1, 2>}]} {
    %c0_i32 = arith.constant 0 : i32
    %0 = arith.cmpi eq, %arg1, %c0_i32 : i32
    %1 = arith.extui %0 : i1 to i32
    %c0_i32_0 = arith.constant 0 : i32
    %2 = arith.cmpi ne, %1, %c0_i32_0 : i32
    scf.if %2 {
      %cst_20 = arith.constant 0.000000e+00 : f32
      %15 = vector.broadcast %cst_20 : f32 to vector<1x3x32xf32>
      %c0_21 = arith.constant 0 : index
      %c0_22 = arith.constant 0 : index
      %c0_23 = arith.constant 0 : index
      %16 = vector.load %arg12[%c0_21, %c0_22, %c0_23] : memref<1x3x32xf32, #tpu.memory_space<vmem>>, vector<1x3x32xf32>
      tpu.vector_store %arg12[%c0_21, %c0_22, %c0_23], %15 {strides = array<i32>} : memref<1x3x32xf32, #tpu.memory_space<vmem>>, vector<1x3x32xf32>,
    } else {
    }
    %c0 = arith.constant 0 : index
    %c0_1 = arith.constant 0 : index
    %c0_2 = arith.constant 0 : index
    %3 = vector.load %arg2[%c0, %c0_1, %c0_2] : memref<1x8x32xf32, #tpu.memory_space<vmem>>, vector<1x8x32xf32>
    %c0_3 = arith.constant 0 : index
    %c0_4 = arith.constant 0 : index
    %c0_5 = arith.constant 0 : index
    %4 = vector.load %arg3[%c0_3, %c0_4, %c0_5] : memref<1x1x8xf32, #tpu.memory_space<vmem>>, vector<1x1x8xf32>
    %c0_6 = arith.constant 0 : index
    %c0_7 = arith.constant 0 : index
    %c0_8 = arith.constant 0 : index
    %5 = vector.load %arg4[%c0_6, %c0_7, %c0_8] : memref<1x1x8xf32, #tpu.memory_space<vmem>>, vector<1x1x8xf32>
    %c0_9 = arith.constant 0 : index
    %c0_10 = arith.constant 0 : index
    %c0_11 = arith.constant 0 : index
    %6 = vector.load %arg5[%c0_9, %c0_10, %c0_11] : memref<1x1x8xf32, #tpu.memory_space<vmem>>, vector<1x1x8xf32>
    %7 = tpu.concatenate %4, %5, %6 in 1 : vector<1x1x8xf32>, vector<1x1x8xf32>, vector<1x1x8xf32> -> vector<1x3x8xf32>
    %c0_12 = arith.constant 0 : index
    %c0_13 = arith.constant 0 : index
    %c0_14 = arith.constant 0 : index
    %8 = vector.load %arg12[%c0_12, %c0_13, %c0_14] : memref<1x3x32xf32, #tpu.memory_space<vmem>>, vector<1x3x32xf32>
    "tpu.trace_start"() <{level = 10 : i32, message = "bst,btd->bsd"}> : () -> ()
    %cst = arith.constant dense<0.000000e+00> : vector<1x3x32xf32>
    %9 = tpu.matmul %7, %3, %cst {dimension_numbers = #tpu.dot_dimension_numbers<[2], [1], [1], [2], [0, 0, 0, 1, 1, 2], [0], [0]>} : vector<1x3x8xf32>, vector<1x8x32xf32>, vector<1x3x32xf32> -> vector<1x3x32xf32>
    "tpu.trace_stop"() : () -> ()
    %10 = arith.addf %8, %9 : vector<1x3x32xf32>
    %c0_15 = arith.constant 0 : index
    %c0_16 = arith.constant 0 : index
    %c0_17 = arith.constant 0 : index
    %11 = vector.load %arg12[%c0_15, %c0_16, %c0_17] : memref<1x3x32xf32, #tpu.memory_space<vmem>>, vector<1x3x32xf32>
    tpu.vector_store %arg12[%c0_15, %c0_16, %c0_17], %10 {strides = array<i32>} : memref<1x3x32xf32, #tpu.memory_space<vmem>>, vector<1x3x32xf32>,
    %c0_i32_18 = arith.constant 0 : i32
    %12 = arith.cmpi eq, %arg1, %c0_i32_18 : i32
    %13 = arith.extui %12 : i1 to i32
    %c0_i32_19 = arith.constant 0 : i32
    %14 = arith.cmpi ne, %13, %c0_i32_19 : i32
    scf.if %14 {
      %c0_20 = arith.constant 0 : index
      %c0_21 = arith.constant 0 : index
      %c0_22 = arith.constant 0 : index
      %15 = vector.load %arg12[%c0_20, %c0_21, %c0_22] : memref<1x3x32xf32, #tpu.memory_space<vmem>>, vector<1x3x32xf32>
      %c0_23 = arith.constant 0 : index
      %c0_24 = arith.constant 0 : index
      %c0_25 = arith.constant 0 : index
      %16 = vector.load %arg6[%c0_23, %c0_24, %c0_25] : memref<1x1x3xf32, #tpu.memory_space<vmem>>, vector<1x1x3xf32>
      %17 = vector.shape_cast %16 : vector<1x1x3xf32> to vector<1x3xf32>
      %cst_26 = arith.constant 9.99999997E-7 : f32
      %18 = vector.broadcast %cst_26 : f32 to vector<1x3xf32>
      %19 = arith.addf %17, %18 : vector<1x3xf32>
      %20 = vector.extract_strided_slice %15 {offsets = [0, 0, 0], sizes = [1, 1, 32], strides = [1, 1, 1]} : vector<1x3x32xf32> to vector<1x1x32xf32>
      %21 = vector.shape_cast %20 : vector<1x1x32xf32> to vector<1x32xf32>
      %22 = vector.extract_strided_slice %19 {offsets = [0, 0], sizes = [1, 1], strides = [1, 1]} : vector<1x3xf32> to vector<1x1xf32>
      %23 = vector.broadcast %22 : vector<1x1xf32> to vector<1x32xf32>
      %24 = arith.divf %21, %23 : vector<1x32xf32>
      %25 = vector.extract_strided_slice %15 {offsets = [0, 1, 0], sizes = [1, 1, 32], strides = [1, 1, 1]} : vector<1x3x32xf32> to vector<1x1x32xf32>
      %26 = vector.shape_cast %25 : vector<1x1x32xf32> to vector<1x32xf32>
      %27 = vector.extract_strided_slice %19 {offsets = [0, 1], sizes = [1, 1], strides = [1, 1]} : vector<1x3xf32> to vector<1x1xf32>
      %28 = vector.broadcast %27 : vector<1x1xf32> to vector<1x32xf32>
      %29 = arith.divf %26, %28 : vector<1x32xf32>
      %30 = vector.extract_strided_slice %15 {offsets = [0, 2, 0], sizes = [1, 1, 32], strides = [1, 1, 1]} : vector<1x3x32xf32> to vector<1x1x32xf32>
      %31 = vector.shape_cast %30 : vector<1x1x32xf32> to vector<1x32xf32>
      %32 = vector.extract_strided_slice %19 {offsets = [0, 2], sizes = [1, 1], strides = [1, 1]} : vector<1x3xf32> to vector<1x1xf32>
      %33 = vector.broadcast %32 : vector<1x1xf32> to vector<1x32xf32>
      %34 = arith.divf %31, %33 : vector<1x32xf32>
      %c0_27 = arith.constant 0 : index
      %c0_28 = arith.constant 0 : index
      %35 = vector.load %arg7[%c0_27, %c0_28] : memref<64x32xf32, #tpu.memory_space<vmem>>, vector<64x32xf32>
      %c0_29 = arith.constant 0 : index
      %c0_30 = arith.constant 0 : index
      %36 = vector.load %arg8[%c0_29, %c0_30] : memref<1x32xf32, #tpu.memory_space<vmem>>, vector<1x32xf32>
      %37 = tpu.concatenate %29, %24 in 0 : vector<1x32xf32>, vector<1x32xf32> -> vector<2x32xf32>
      %38 = tpu.concatenate %24, %34 in 0 : vector<1x32xf32>, vector<1x32xf32> -> vector<2x32xf32>
      %39 = vector.extract_strided_slice %35 {offsets = [0, 0], sizes = [32, 32], strides = [1, 1]} : vector<64x32xf32> to vector<32x32xf32>
      %cst_31 = arith.constant dense<0.000000e+00> : vector<2x32xf32>
      %40 = tpu.matmul %37, %39, %cst_31 {dimension_numbers = #tpu.dot_dimension_numbers<[1], [0], [0], [1], [0, 0, 1, 1], [], []>} : vector<2x32xf32>, vector<32x32xf32>, vector<2x32xf32> -> vector<2x32xf32>
      %41 = vector.extract_strided_slice %35 {offsets = [32, 0], sizes = [32, 32], strides = [1, 1]} : vector<64x32xf32> to vector<32x32xf32>
      %cst_32 = arith.constant dense<0.000000e+00> : vector<2x32xf32>
      %42 = tpu.matmul %38, %41, %cst_32 {dimension_numbers = #tpu.dot_dimension_numbers<[1], [0], [0], [1], [0, 0, 1, 1], [], []>} : vector<2x32xf32>, vector<32x32xf32>, vector<2x32xf32> -> vector<2x32xf32>
      %43 = arith.addf %40, %42 : vector<2x32xf32>
      %44 = vector.broadcast %36 : vector<1x32xf32> to vector<2x32xf32>
      %45 = arith.addf %43, %44 : vector<2x32xf32>
      %cst_33 = arith.constant 0.000000e+00 : f32
      %46 = vector.broadcast %cst_33 : f32 to vector<2x32xf32>
      %47 = arith.maximumf %45, %46 : vector<2x32xf32>
      %48 = vector.extract_strided_slice %47 {offsets = [0, 0], sizes = [1, 32], strides = [1, 1]} : vector<2x32xf32> to vector<1x32xf32>
      %49 = vector.extract_strided_slice %47 {offsets = [1, 0], sizes = [1, 32], strides = [1, 1]} : vector<2x32xf32> to vector<1x32xf32>
      %c0_34 = arith.constant 0 : index
      %c0_35 = arith.constant 0 : index
      %50 = vector.load %arg9[%c0_34, %c0_35] : memref<96x2xf32, #tpu.memory_space<vmem>>, vector<96x2xf32>
      %c0_36 = arith.constant 0 : index
      %c0_37 = arith.constant 0 : index
      %51 = vector.load %arg10[%c0_36, %c0_37] : memref<1x2xf32, #tpu.memory_space<vmem>>, vector<1x2xf32>
      %52 = vector.extract_strided_slice %50 {offsets = [0, 0], sizes = [32, 2], strides = [1, 1]} : vector<96x2xf32> to vector<32x2xf32>
      %cst_38 = arith.constant dense<0.000000e+00> : vector<1x2xf32>
      %53 = tpu.matmul %24, %52, %cst_38 {dimension_numbers = #tpu.dot_dimension_numbers<[1], [0], [0], [1], [0, 0, 1, 1], [], []>} : vector<1x32xf32>, vector<32x2xf32>, vector<1x2xf32> -> vector<1x2xf32>
      %54 = vector.extract_strided_slice %50 {offsets = [32, 0], sizes = [32, 2], strides = [1, 1]} : vector<96x2xf32> to vector<32x2xf32>
      %cst_39 = arith.constant dense<0.000000e+00> : vector<1x2xf32>
      %55 = tpu.matmul %48, %54, %cst_39 {dimension_numbers = #tpu.dot_dimension_numbers<[1], [0], [0], [1], [0, 0, 1, 1], [], []>} : vector<1x32xf32>, vector<32x2xf32>, vector<1x2xf32> -> vector<1x2xf32>
      %56 = arith.addf %53, %55 : vector<1x2xf32>
      %57 = vector.extract_strided_slice %50 {offsets = [64, 0], sizes = [32, 2], strides = [1, 1]} : vector<96x2xf32> to vector<32x2xf32>
      %cst_40 = arith.constant dense<0.000000e+00> : vector<1x2xf32>
      %58 = tpu.matmul %49, %57, %cst_40 {dimension_numbers = #tpu.dot_dimension_numbers<[1], [0], [0], [1], [0, 0, 1, 1], [], []>} : vector<1x32xf32>, vector<32x2xf32>, vector<1x2xf32> -> vector<1x2xf32>
      %59 = arith.addf %56, %58 : vector<1x2xf32>
      %60 = arith.addf %59, %51 : vector<1x2xf32>
      %61 = vector.shape_cast %60 : vector<1x2xf32> to vector<1x1x2xf32>
      %c0_41 = arith.constant 0 : index
      %c0_42 = arith.constant 0 : index
      %c0_43 = arith.constant 0 : index
      %62 = vector.load %arg11[%c0_41, %c0_42, %c0_43] : memref<1x1x2xf32, #tpu.memory_space<vmem>>, vector<1x1x2xf32>
      tpu.vector_store %arg11[%c0_41, %c0_42, %c0_43], %61 {strides = array<i32>} : memref<1x1x2xf32, #tpu.memory_space<vmem>>, vector<1x1x2xf32>,
    } else {
    }
    return
  }
  func.func @transform_0(%arg0: i32, %arg1: i32) -> (i32, i32, i32) {
    %c0_i32 = arith.constant 0 : i32
    %c0_i32_0 = arith.constant 0 : i32
    return %arg0, %arg1, %c0_i32 : i32, i32, i32
  }
  func.func @transform_1(%arg0: i32, %arg1: i32) -> (i32, i32, i32) {
    %c0_i32 = arith.constant 0 : i32
    %c0_i32_0 = arith.constant 0 : i32
    return %arg0, %c0_i32, %arg1 : i32, i32, i32
  }
  func.func @transform_2(%arg0: i32, %arg1: i32) -> (i32, i32, i32) {
    %c0_i32 = arith.constant 0 : i32
    %c0_i32_0 = arith.constant 0 : i32
    return %arg0, %c0_i32, %arg1 : i32, i32, i32
  }
  func.func @transform_3(%arg0: i32, %arg1: i32) -> (i32, i32, i32) {
    %c0_i32 = arith.constant 0 : i32
    %c0_i32_0 = arith.constant 0 : i32
    return %arg0, %c0_i32, %arg1 : i32, i32, i32
  }
  func.func @transform_4(%arg0: i32, %arg1: i32) -> (i32, i32, i32) {
    %c0_i32 = arith.constant 0 : i32
    %c0_i32_0 = arith.constant 0 : i32
    %c0_i32_1 = arith.constant 0 : i32
    return %arg0, %c0_i32, %c0_i32_0 : i32, i32, i32
  }
  func.func @transform_5(%arg0: i32, %arg1: i32) -> (i32, i32) {
    %c0_i32 = arith.constant 0 : i32
    %c0_i32_0 = arith.constant 0 : i32
    %c0_i32_1 = arith.constant 0 : i32
    return %c0_i32, %c0_i32_0 : i32, i32
  }
  func.func @transform_6(%arg0: i32, %arg1: i32) -> (i32, i32) {
    %c0_i32 = arith.constant 0 : i32
    %c0_i32_0 = arith.constant 0 : i32
    %c0_i32_1 = arith.constant 0 : i32
    return %c0_i32, %c0_i32_0 : i32, i32
  }
  func.func @transform_7(%arg0: i32, %arg1: i32) -> (i32, i32) {
    %c0_i32 = arith.constant 0 : i32
    %c0_i32_0 = arith.constant 0 : i32
    %c0_i32_1 = arith.constant 0 : i32
    return %c0_i32, %c0_i32_0 : i32, i32
  }
  func.func @transform_8(%arg0: i32, %arg1: i32) -> (i32, i32) {
    %c0_i32 = arith.constant 0 : i32
    %c0_i32_0 = arith.constant 0 : i32
    %c0_i32_1 = arith.constant 0 : i32
    return %c0_i32, %c0_i32_0 : i32, i32
  }
  func.func @transform_9(%arg0: i32, %arg1: i32) -> (i32, i32, i32) {
    %c0_i32 = arith.constant 0 : i32
    %c0_i32_0 = arith.constant 0 : i32
    %c0_i32_1 = arith.constant 0 : i32
    return %arg0, %c0_i32, %c0_i32_0 : i32, i32, i32
  }
}

</mosaic_0001>

<bundles_post_ra>
// kernel: tpu_custom_call.1
= control target key start
LH: loop header
LB: loop body
LE: loop exit
PB: predicated region body
PF: predicated region fallthrough
CT: control target
= control target key end

     0   :  { %s1644_s0 = inlined_call_operand.vmem [shape: f32[2,8,32], index: 0, kind: input, shape index: {}]   ;;  %s1645_s1 = inlined_call_operand.vmem [shape: f32[2,1,8], index: 1, kind: input, shape index: {}]   ;;  %s1646_s2 = inlined_call_operand.vmem [shape: f32[2,1,8], index: 2, kind: input, shape index: {}]   ;;  %s1647_s3 = inlined_call_operand.vmem [shape: f32[2,1,8], index: 3, kind: input, shape index: {}]   ;;  %s1648_s4 = inlined_call_operand.vmem [shape: f32[2,1,3], index: 4, kind: input, shape index: {}]   ;;  %s1649_s5 = inlined_call_operand.vmem [shape: f32[64,32], index: 5, kind: input, shape index: {}]   ;;  %s1650_s6 = inlined_call_operand.vmem [shape: f32[1,32], index: 6, kind: input, shape index: {}]   ;;  %s1651_s7 = inlined_call_operand.vmem [shape: f32[96,2], index: 7, kind: input, shape index: {}]   ;;  %s1652_s8 = inlined_call_operand.vmem [shape: f32[1,2], index: 8, kind: input, shape index: {}]   ;;  %s1653_s9 = inlined_call_operand.hbm [shape: f32[2,1,2], index: 9, kind: output, shape index: {}]  }
   0x1   :  { %1656 = sst [smem:[#allocation9_spill]] %s1645_s1 }
   0x2   :  { %14 = vsyncpa [#allocation4], 0 }
   0x3   :  { %16 = vsyncpa [#allocation4 + $0x1], 0  ;;  %s1423_s30 = smov 0   ;;  %s1425_s10 = smov 0  }
   0x4   :  { %s1427_s11 = smov 0   ;;  %s1429_s12 = smov 0  }
   0x5   :  { %s1431_s13 = smov 0   ;;  %s1433_s14 = smov 0  }
   0x6 LB: > { %1657 = sst [smem:[#allocation6_spill]] %s1361_s13  ;;  %s1114_s15 = sadd.s32 4294967295, %s1365_s14   ;;  %s1365_s14 = sphi %s1433_s14, %s22_s14   ;;  %s1361_s13 = sphi %s1431_s13, %s1665_s13   ;;  %s1357_s12 = sphi %s1429_s12, %s1664_s12   ;;  %s1353_s11 = sphi %s1427_s11, %s1668_s11   ;;  %s1349_s10 = sphi %s1425_s10, %s1667_s10   ;;  %s1345_s30 = sphi %s1423_s30, %s1666_s30  }
   0x7   : > { %s1115_s16 = sadd.s32 4294967294, %s1365_s14   ;;  %s34_s17 = sadd.s32 1, %s1361_s13 }
   0x8   : > { %s263_s18 = sadd.s32 1, %s1353_s11  ;;  %p36_p0 = scmp.ge.s32.totalorder %s34_s17, 2 }
   0x9   : > { %p273_p1 = scmp.ne.s32.totalorder %s1353_s11, %s1349_s10  ;;  %p274_p2 = scmp.eq.s32.totalorder %s1114_s15, 1 }
   0xa   : > { %p279_p3 = scmp.ne.s32.totalorder %s1349_s10, %s1345_s30  ;;  %s1670_s17 = smov (%p36_p0, %s34_s17), 0 }
   0xb   : > { %1658 = sst [smem:[#allocation7_spill]] %s1670_s17  ;;  %p1463_p4 = por %p274_p2, %p273_p1 }
   0xc   : > { %p280_p5 = scmp.eq.s32.totalorder %s1115_s16, 1  ;;  %s260_s20 = ssub.s32 %s1361_s13, %s1670_s17 }
   0xd   : > { %p1118_p6 = scmp.ge.s32.totalorder %s1365_s14, 1  ;;  %p261_p7 = scmp.eq.s32.totalorder %s260_s20, 0 }
   0xe   : > { %p1470_p8 = por %p280_p5, %p279_p3  ;;  %p353_p9 = scmp.lt.s32.totalorder %s1365_s14, 3 }
   0xf   : > { %s1476_s22 = scalar_select %p261_p7, %s1353_s11, %s263_s18  }
  0x10   : > { %p354_p10 = pnand %p1118_p6, %p353_p9 }
  0x11   : > { %1661 = sst [smem:[#allocation8_spill]] %s1476_s22  ;;  %p411_p11 = scmp.lt.s32.totalorder (!%p354_p10), %s1357_s12, 1 }
  0x12   : > { %357 = sbr.rel (%p354_p10) target bundleno = 656 (0x290), region = 56  ;;  %s1662_s1 = sld [smem:[#allocation9_spill]] (!%p354_p10) }
  0x13   : > { %s1129_s13 = sshll.u32 (!%p354_p10), %s1357_s12, 4  ;;  %s1372_s29 = smov (!%p354_p10), [#allocation3]  }
  0x17   : > { %v1367_v0 = vmov 0.0   ;;  %vm1368_vm0 = vmmov 0   ;;  %s412_s23 = scalar_select %p411_p11, %s1357_s12, 1  ;;  %v1369_v1 = vmov 0   ;;  %v1370_v2 = vmov 2   ;;  %v583_v12 = vld [vmem:[%s1649_s5 + $0x18] sm:$0xff] }
  0x18   : > { %1159 = vmatprep.subr.mxu0 %v1367_v0  ;;  %1161 = vmatprep.mubr.msk.f32.mxu0 %vm1368_vm0, %v1367_v0  ;;  %vm461_vm1 = vcmask 1040384   ;;  %vm463_vm2 = vcmask 1041408   ;;  %vm466_vm3 = vcmask 64512   ;;  %vm443_vm4 = vcmask 256000   ;;  %v587_v13 = vld [vmem:[%s1649_s5 + $0x38] sm:$0xff]  ;;  %v582_v14 = vld [vmem:[%s1649_s5 + $0x10] sm:$0xff] }
  0x19   : > { %1279 = vset.pattern.permute.xlu0 %v1369_v1  ;;  %1281 = vset.pattern.permute.xlu1 %v1370_v2  ;;  %s1119_s24 = sshll.u32 %s412_s23, 3  ;;  %s423_s27 = scalar_lea.vmem %s1662_s1, %s412_s23  ;;  %v1371_v11 = vmov 1   ;;  %444 = vst.msk [vmem:[#allocation2] sm:$0x7] %vm443_vm4, %v1367_v0  ;;  %v586_v15 = vld [vmem:[%s1649_s5 + $0x30] sm:$0xff]  ;;  %v581_v16 = vld [vmem:[%s1649_s5 + $0x8] sm:$0xff]  ;;  %v554_v20 = vlaneseq }
  0x1a   : > { %1164 = vmatprep.subr.mxu1 %v1367_v0  ;;  %1172 = vmatprep.mubr.msk.f32.mxu1 %vm1368_vm0, %v1367_v0  ;;  %s417_s15 = scalar_lea.vmem %s1644_s0, %s1119_s24  ;;  %s429_s20 = scalar_lea.vmem %s1646_s2, %s412_s23  ;;  %v446_v3 = vld [vmem:[%s423_s27] sm:$0x1]  ;;  %v585_v17 = vld [vmem:[%s1649_s5 + $0x28] sm:$0xff]  ;;  %vm600_vm5 = vcmask 261120   ;;  %v758_v43 = vld [vmem:[%s1651_s7 + $0x18] sm:$0xff]  ;;  %vm988_vm6 = vcmask 8192  }
  0x1b   : > { %v445_v4 = vld [vmem:[%s417_s15] sm:$0xff]  ;;  %s435_s22 = scalar_lea.vmem %s1647_s3, %s412_s23  ;;  %s438_s1 = scalar_lea.vmem %s1648_s4, %s412_s23  ;;  %1165 = vmatpush3.msra.mxu1 %v587_v13  ;;  %v555_v22 = vshrl.u32 %v554_v20, 7  ;;  %v762_v46 = vld [vmem:[%s1651_s7 + $0x38] sm:$0xff]  ;;  %v757_v47 = vld [vmem:[%s1651_s7 + $0x10] sm:$0xff] }
  0x1c   : > { %v1120_v5 = vld [vmem:[%s429_s20] ss:$0 sm:$0xff]  ;;  %1160 = vmatpush3.msra.mxu0 %v445_v4  ;;  %1166 = vmatprep.subr.mxu1 %v1367_v0  ;;  %v756_v48 = vld [vmem:[%s1651_s7 + $0x8] sm:$0xff]  ;;  %v761_v50 = vld [vmem:[%s1651_s7 + $0x30] sm:$0xff]  ;;  %s409_s20 = sand.u32 1, %s1349_s10   ;;  %s1001_s24 = scalar_lea.hbm %s1653_s9, %s1129_s13 }
  0x1d   : > { %v1121_v6 = vld [vmem:[%s435_s22] ss:$0 sm:$0xff]  ;;  %v462_v7 = vsel %vm461_vm1, %v446_v3, %v1120_v5  ;;  %1175 = vmatprep.subr.mxu0 %v1367_v0  ;;  %1167 = vmatpush3.msra.mxu1 %v586_v15  ;;  %v556_v24 = vsub.s32 0, %v555_v22  ;;  %v760_v51 = vld [vmem:[%s1651_s7 + $0x28] sm:$0xff]  ;;  %v766_v61 = vld [vmem:[%s1651_s7 + $0x58] sm:$0xff]  ;;  %s991_s27 = scalar_lea.sflag [#allocation4], %s409_s20 }
  0x1e   : > { %v547_v8 = vld [vmem:[%s438_s1] sm:$0x1]  ;;  %v464_v9 = vsel %vm463_vm2, %v462_v7, %v1121_v6  ;;  %1168 = vmatprep.subr.mxu1 %v1367_v0  ;;  %v765_v62 = vld [vmem:[%s1651_s7 + $0x50] sm:$0xff]  ;;  %v764_v1 = vld [vmem:[%s1651_s7 + $0x48] sm:$0xff]  ;;  %s410_s1 = scalar_lea.vmem [#allocation3], %s409_s20  ;;  %s1293_s12 = sshll.u32 %s1372_s29, 4  ;;  %s1294_s12 = int_to_ptr.vmem [resolvable:$false] %s1293_s12 }
  0x1f   : > { %v548_v10 = vadd.f32 1e-06, %v547_v8  ;;  %1162 = vmatmul.mubr.msk.f32.vlgmr.msra.gmra.mxu0 %vm466_vm3, %v464_v9  ;;  %v580_v18 = vld [vmem:[%s1649_s5] sm:$0xff]  ;;  %1169 = vmatpush3.msra.mxu1 %v585_v17  ;;  %s1003_s17 = sshll.u32 %s410_s1, 4  ;;  %s1295_s15 = scalar_lea.vmem %s1294_s12, 32  ;;  %s1004_s17 = int_to_ptr.vmem [resolvable:$true] %s1003_s17 }
  0x20   : > { %1183 = vmatprep.mubr.msk.f32.mxu0 %vm1368_vm0, %v1367_v0  ;;  %1176 = vmatpush3.msra.mxu0 %v583_v12  ;;  %v584_v19 = vld [vmem:[%s1649_s5 + $0x20] sm:$0xff]  ;;  %s1289_s28 = scalar_lea.vmem %s1004_s17, 16  ;;  %p1296_p1 = scmp.lt.s32.totalorder %s1004_s17, %s1294_s12 }
  0x21   : > { %551 = vperm.xlu0 %1279, %v548_v10   ;;  %571 = vperm.xlu1 %1281, %v548_v10   ;;  %v465_v29 = vld [vmem:[#allocation2] sm:$0x7]  ;;  %p1290_p12 = scmp.ne.s32.totalorder %s1004_s17, %s1289_s28  ;;  %p1297_p2 = scmp.lt.s32.totalorder %s1295_s15, %s1289_s28 }
  0x22   : > { %1177 = vmatprep.subr.mxu0 %v1367_v0  ;;  %1170 = vmatprep.subr.mxu1 %v1367_v0  ;;  %v755_v49 = vld [vmem:[%s1651_s7] sm:$0xff] }
  0x23   : > { %1178 = vmatpush3.msra.mxu0 %v582_v14  ;;  %1171 = vmatpush3.msra.mxu1 %v584_v19  ;;  %v759_v52 = vld [vmem:[%s1651_s7 + $0x20] sm:$0xff]  ;;  %p1291_p13 = pnand %p1290_p12, %p1463_p4  ;;  %p1298_p3 = por %p1297_p2, %p1296_p1 }
  0x24   : > { %1179 = vmatprep.subr.mxu0 %v1367_v0  ;;  %1186 = vmatprep.subr.mxu1 %v1367_v0  ;;  %v1125_v54 = vld [vmem:[%s1650_s6] ss:$0 sm:$0xff] }
  0x25   : > { %1280 = vset.pattern.permute.xlu0 %v1371_v11  ;;  %1180 = vmatpush3.msra.mxu0 %v581_v16  ;;  %v763_v3 = vld [vmem:[%s1651_s7 + $0x40] sm:$0xff]  ;;  %p1292_p0 = pneg %p1291_p13 }
  0x26   : > { %561 = vperm.xlu0 %1280, %v548_v10   ;;  %1181 = vmatprep.subr.mxu0 %v1367_v0  ;;  %v767_v8 = vld [vmem:[%s1652_s8] sm:$0x1] }
  0x27   : > { %1182 = vmatpush3.msra.mxu0 %v580_v18  ;;  %p1299_p5 = pnand %p1298_p3, %p1292_p0 }
  0x28   : > { %1197 = vmatprep.subr.mxu0 %v1367_v0 }
  0x2a   : > { %1282 = vset.pattern.permute.xlu0 %v1370_v2 }
  0x9c   : > { %v552_v21 = vpop.permute.xlu0 %551  ;;  %v572_v23 = vpop.permute.xlu1 %571 }
  0x9d   : > { %v577_v26 = vrot.slane %v572_v23, %v556_v24  ;;  %v557_v28 = vrot.slane %v552_v21, %v556_v24 }
  0x9f   : > { %1283 = vrcp.f32 %v577_v26 }
  0xa1   : > { %v562_v25 = vpop.permute.xlu0 %561 }
  0xa2   : > { %v567_v27 = vrot.slane %v562_v25, %v556_v24 }
  0xa4   : > { %1285 = vrcp.f32 %v567_v27 }
  0xa5   : > { %1287 = vrcp.f32 %v557_v28 }
  0xac   : > { %v1284_v33 = vpop.eup %1283 }
  0xb1   : > { %v1286_v34 = vpop.eup %1285 }
  0xb2   : > { %v1288_v35 = vpop.eup %1287 }
  0xdf   : > { %v536_v30 = vpop.f32.mrf.mxu0 }
  0xe0   : > { %v540_v31 = vadd.f32 %v536_v30, %v465_v29 }
  0xe1   : > { %v1163_v32 = vpop.f32.mrf.mxu0 }
  0xe2   : > { %542 = vst.msk [vmem:[#allocation2] sm:$0x7] %vm443_vm4, %v540_v31 }
  0xe9   : > { %v546_v36 = vld [vmem:[#allocation2] sm:$0x7] }
  0xea   : > { %v559_v37 = vmul.f32 %v1288_v35, %v546_v36  ;;  %v579_v38 = vmul.f32 %v1284_v33, %v546_v36  ;;  %v569_v39 = vmul.f32 %v1286_v34, %v546_v36 }
  0xec   : > { %v597_v40 = vrot.slane %v579_v38, 1  ;;  %v590_v41 = vrot.slane %v569_v39, 1  ;;  %v593_v42 = vrot.slane %v559_v37, 7 }
  0xee   : > { %v599_v44 = vsel %vm461_vm1, %v559_v37, %v597_v40  ;;  %v595_v45 = vsel %vm461_vm1, %v590_v41, %v593_v42 }
  0xef   : > { %1173 = vmatmul.mubr.msk.f32.vlgmr.msra.gmra.mxu1 %vm600_vm5, %v599_v44  ;;  %1184 = vmatmul.mubr.msk.f32.vlgmr.msra.gmra.mxu0 %vm600_vm5, %v595_v45 }
  0xf0   : > { %1198 = vmatpush3.msra.mxu0 %v758_v43  ;;  %1205 = vmatprep.mubr.msk.f32.mxu0 %vm1368_vm0, %v1367_v0 }
  0xf1   : > { %1199 = vmatprep.subr.mxu0 %v1367_v0  ;;  %1187 = vmatpush3.msra.mxu1 %v762_v46 }
  0xf2   : > { %1200 = vmatpush3.msra.mxu0 %v757_v47  ;;  %1188 = vmatprep.subr.mxu1 %v1367_v0 }
  0xf3   : > { %1201 = vmatprep.subr.mxu0 %v1367_v0  ;;  %1194 = vmatprep.mubr.msk.f32.mxu1 %vm1368_vm0, %v1367_v0 }
  0xf4   : > { %1202 = vmatpush3.msra.mxu0 %v756_v48  ;;  %1189 = vmatpush3.msra.mxu1 %v761_v50 }
  0xf5   : > { %1203 = vmatprep.subr.mxu0 %v1367_v0  ;;  %1190 = vmatprep.subr.mxu1 %v1367_v0 }
  0xf6   : > { %1204 = vmatpush3.msra.mxu0 %v755_v49  ;;  %1191 = vmatpush3.msra.mxu1 %v760_v51 }
  0xf7   : > { %1206 = vmatmul.mubr.msk.f32.vlgmr.msra.gmra.mxu0 %vm600_vm5, %v559_v37  ;;  %1192 = vmatprep.subr.mxu1 %v1367_v0 }
  0xf8   : > { %1193 = vmatpush3.msra.mxu1 %v759_v52 }
  0xf9   : > { %1208 = vmatprep.subr.mxu1 %v1367_v0 }
 0x1af   : > { %v670_v53 = vpop.f32.mrf.mxu1  ;;  %v743_v55 = vpop.f32.mrf.mxu0 }
 0x1b0   : > { %v744_v56 = vadd.f32 %v743_v55, %v670_v53 }
 0x1b1   : > { %v1174_v57 = vpop.f32.mrf.mxu1  ;;  %v1185_v58 = vpop.f32.mrf.mxu0 }
 0x1b2   : > { %v753_v59 = vadd.f32 %v1125_v54, %v744_v56 }
 0x1b4   : > { %v754_v60 = vmax.f32 %v753_v59, 0.0 }
 0x1b6   : > { %1195 = vmatmul.mubr.msk.f32.vlgmr.msra.gmra.mxu1 %vm600_vm5, %v754_v60  ;;  %v913_v4 = vrot.slane %v754_v60, 1 }
 0x1b7   : > { %v909_v63 = vpop.f32.mrf.mxu0  ;;  %1209 = vmatpush3.msra.mxu1 %v766_v61  ;;  %1216 = vmatprep.mubr.msk.f32.mxu1 %vm1368_vm0, %v1367_v0 }
 0x1b8   : > { %1210 = vmatprep.subr.mxu1 %v1367_v0 }
 0x1b9   : > { %v1207_v2 = vpop.f32.mrf.mxu0  ;;  %1211 = vmatpush3.msra.mxu1 %v765_v62 }
 0x1ba   : > { %1212 = vmatprep.subr.mxu1 %v1367_v0 }
 0x1bb   : > { %1213 = vmatpush3.msra.mxu1 %v764_v1 }
 0x1bc   : > { %1214 = vmatprep.subr.mxu1 %v1367_v0 }
 0x1bd   : > { %1215 = vmatpush3.msra.mxu1 %v763_v3 }
 0x1be   : > { %1217 = vmatmul.mubr.msk.f32.vlgmr.msra.gmra.mxu1 %vm600_vm5, %v913_v4 }
 0x276   : > { %v837_v5 = vpop.f32.mrf.mxu1 }
 0x277   : > { %v910_v7 = vadd.f32 %v909_v63, %v837_v5 }
 0x278   : > { %v1196_v6 = vpop.f32.mrf.mxu1 }
 0x27e   : > { %v982_v9 = vpop.f32.mrf.mxu1 }
 0x27f   : > { %v986_v10 = vadd.f32 %v982_v9, %v910_v7 }
 0x280   : > { %v1218_v11 = vpop.f32.mrf.mxu1 }
 0x281   : > { %v987_v0 = vadd.f32 %v986_v10, %v767_v8 }
 0x283   : > { %989 = vst.msk [vmem:[%s410_s1] sm:$0x1] %vm988_vm6, %v987_v0 }
 0x284   : > { %1302 = shalt.err (!%p1299_p5)
}
 0x285   : > { %s1303_s16 = scalar_lea.hbm %s1001_s24, 16  ;;  %s1307_s25 = scalar_lea.hbm %s1653_s9, 32 }
 0x286   : > { %p1304_p6 = scmp.ne.s32.totalorder %s1001_s24, %s1303_s16  ;;  %p1308_p10 = scmp.lt.s32.totalorder %s1001_s24, %s1653_s9 }
 0x287   : > { %p1309_p11 = scmp.lt.s32.totalorder %s1307_s25, %s1303_s16 }
 0x288   : > { %p1305_p7 = pnand %p1304_p6, %p1463_p4 }
 0x289   : > { %p1310_p12 = por %p1309_p11, %p1308_p10 }
 0x28a   : > { %p1306_p9 = pneg %p1305_p7 }
 0x28c   : > { %p1311_p13 = pnand %p1310_p12, %p1306_p9 }
 0x28e   : > { %1314 = shalt.err (!%p1311_p13)
}
 0x28f   : > { %1219 = dma.vmem_to_hbm [thread:$0]  (%p1463_p4), %s1004_s17, 16, %s1001_s24, %s991_s27  }
 0x290 PF: > { %p1225_p0 = scmp.ge.s32.totalorder %s1365_s14, 2  ;;  %s1015_s1 = sand.u32 1, %s1345_s30  }
 0x291   : > { %s1016_s22 = scalar_lea.sflag [#allocation4], %s1015_s1 }
 0x292   : > { %p1222_p1 = pnand %p1225_p0, %p1470_p8 }
 0x294   : > { %p1223_p2 = pneg %p1222_p1 }
 0x296   : > { %1340 = dma.done.wait (%p1223_p2), %s1016_s22, 16  }
 0x297   : > { %1342 = vsyncadd (%p1223_p2), %s1016_s22, 4294967280  ;;  %s22_s14 = sadd.s32 1, %s1365_s14   ;;  %s1663_s23 = sld [smem:[#allocation8_spill]] }
 0x298   : > { %p19_p3 = scmp.ge.s32.totalorder %s22_s14, 4   ;;  %s1664_s12 = sld [smem:[#allocation6_spill]] }
 0x299   : > { %s1665_s13 = sld [smem:[#allocation7_spill]]  ;;  %s1666_s30 = smov %s1349_s10 }
 0x29a   : > { %s1667_s10 = smov %s1353_s11  ;;  %21 = sbr.rel (!%p19_p3) target bundleno = 6 (0x6), region = 111 }
 0x29d   : > { %s1668_s11 = smov %s1663_s23 }
 0x29f   :  { %1020 = vsyncpa [#allocation4], 1 }
 0x2a0   :  { %1022 = vsyncpa [#allocation4 + $0x1], 1 }

</bundles_post_ra>
